<compile_context>
chip_gen: v7x
topology: tpu7x:2x2x1
jax: 0.10.0
libtpu: 0.0.40
codegen_flags: <defaults>
</compile_context>

<pallas_src>
import functools
import math

import jax
import jax.numpy as jnp
from jax.experimental import pallas as pl
from jax.experimental.pallas import tpu as pltpu

_INV_SQRT2 = 0.7071067811865476


def _gelu_exact_f32(h):
    # Exact (erf-based) GELU, matching torch.nn.GELU() default, computed in f32.
    return 0.5 * h * (1.0 + jax.lax.erf(h * jnp.float32(_INV_SQRT2)))


def _ffn_kernel_resident(x_ref, w1_ref, b1_ref, w2_ref, b2_ref, o_ref):
    # grid = (token_tiles,).  Weight refs use constant index maps -> resident
    # in VMEM, fetched once.  No accumulator scratch needed.
    h = jnp.dot(x_ref[...].astype(w1_ref.dtype), w1_ref[...],
                preferred_element_type=jnp.float32)
    h = _gelu_exact_f32(h + b1_ref[...].astype(jnp.float32))
    out = jnp.dot(h.astype(w2_ref.dtype), w2_ref[...],
                  preferred_element_type=jnp.float32)
    o_ref[...] = (out + b2_ref[...].astype(jnp.float32)).astype(o_ref.dtype)


def _ffn_kernel_tiled(x_ref, w1_ref, b1_ref, w2_ref, b2_ref, o_ref, acc_ref):
    # grid = (token_tiles, hidden_tiles).  Hidden axis is "arbitrary" and
    # accumulated into an f32 VMEM scratch; b2 is folded into the init.
    k = pl.program_id(1)

    @pl.when(k == 0)
    def _():
        acc_ref[...] = jnp.broadcast_to(
            b2_ref[...].astype(jnp.float32), acc_ref.shape)

    h = jnp.dot(x_ref[...].astype(w1_ref.dtype), w1_ref[...],
                preferred_element_type=jnp.float32)
    h = _gelu_exact_f32(h + b1_ref[...].astype(jnp.float32))
    acc_ref[...] += jnp.dot(h.astype(w2_ref.dtype), w2_ref[...],
                            preferred_element_type=jnp.float32)

    @pl.when(k == pl.num_programs(1) - 1)
    def _():
        o_ref[...] = acc_ref[...].astype(o_ref.dtype)


def _round_up(x, m):
    return (x + m - 1) // m * m


def _pad_axis_to(a, axis, target):
    pad = target - a.shape[axis]
    if pad == 0:
        return a
    widths = [(0, 0)] * a.ndim
    widths[axis] = (0, pad)
    return jnp.pad(a, widths)


def _nbytes(shape, dt):
    return math.prod(shape) * jnp.dtype(dt).itemsize


def _vmem_capacity_bytes():
    try:
        info = pltpu.get_tpu_info()
        cap = getattr(info, "vmem_capacity_bytes", None)
        if cap:
            return int(cap)
    except Exception:
        pass
    return 64 << 20  # conservative (v7x-sized)


@functools.partial(jax.jit, static_argnames=("tm", "th", "force_hidden_tiling"))
def feed_forward(x, w1, b1, w2, b2, *, tm=512, th=512, force_hidden_tiling=False):
    """Fused ViT MLP: gelu(x @ w1 + b1) @ w2 + b2.

    x: (batch, seq, dim); w1: (dim, hidden); b1: (hidden,);
    w2: (hidden, dim); b2: (dim,).
    """
    batch, seq, dim = x.shape
    hidden = w1.shape[1]
    n_tok = batch * seq
    xdt, wdt = x.dtype, w1.dtype

    x2d = x.reshape(n_tok, dim)

    # Tokens: pad only to the sublane multiple of 8 (usually a no-op) and let
    # Pallas handle a partial last block.  dim/hidden are padded to lane
    # multiples of 128 (no-op for real ViT dims); padded rows/cols are zero and
    # contribute exact zeros, padded outputs are sliced off.
    n_tok_p = _round_up(n_tok, 8)
    dim_p = _round_up(dim, 128)
    hidden_p128 = _round_up(hidden, 128)

    tm_eff = min(tm, n_tok_p)                       # both multiples of 8
    n_i = -(-n_tok_p // tm_eff)                     # ceil-div (partial last block OK)

    # VMEM budget: ~100 MB on 128-MiB parts (v5e/v6e), capacity - headroom on
    # 64-MiB parts (v7x).
    cap = min(_vmem_capacity_bytes() - (12 << 20), 100 << 20)

    def _resident_ws(hid):
        return (
            2 * 2 * _nbytes((tm_eff, dim_p), xdt)                     # x/out tiles, dbl-buffered
            + 2 * (_nbytes((dim_p, hid), wdt) + _nbytes((hid, dim_p), wdt)
                   + _nbytes((1, hid), wdt) + _nbytes((1, dim_p), wdt))  # weight pipeline buffers
            + 3 * _nbytes((tm_eff, hid), jnp.float32)                 # f32 h + GELU temporaries
        )

    use_resident = (not force_hidden_tiling) and (
        _resident_ws(hidden_p128) + (4 << 20) <= cap)

    if use_resident:
        hidden_p = hidden_p128
        th_eff = hidden_p
        ws = _resident_ws(hidden_p)
    else:
        th_eff = _round_up(min(th, hidden_p128), 128)
        hidden_p = _round_up(hidden, th_eff)
        ws = (
            2 * (_nbytes((tm_eff, dim_p), xdt) * 2
                 + _nbytes((dim_p, th_eff), wdt) + _nbytes((th_eff, dim_p), wdt)
                 + _nbytes((1, th_eff), wdt) + _nbytes((1, dim_p), wdt))
            + _nbytes((tm_eff, dim_p), jnp.float32)                   # accumulator
            + 3 * _nbytes((tm_eff, th_eff), jnp.float32)              # f32 h + temporaries
        )

    vmem_limit = int(min(max(ws + (8 << 20), 32 << 20), cap))

    # Padded operands (all pads are no-ops for standard ViT sizes).
    x2d_p = _pad_axis_to(_pad_axis_to(x2d, 0, n_tok_p), 1, dim_p)
    w1_p = _pad_axis_to(_pad_axis_to(w1, 0, dim_p), 1, hidden_p)
    b1_p = _pad_axis_to(b1.reshape(1, hidden), 1, hidden_p)
    w2_p = _pad_axis_to(_pad_axis_to(w2, 0, hidden_p), 1, dim_p)
    b2_p = _pad_axis_to(b2.reshape(1, dim), 1, dim_p)

    weight_bytes = (_nbytes((dim_p, hidden_p), wdt) + _nbytes((hidden_p, dim_p), wdt)
                    + _nbytes((1, hidden_p), wdt) + _nbytes((1, dim_p), wdt))
    cost = pl.CostEstimate(
        flops=4 * n_tok_p * dim_p * hidden_p,          # two matmuls
        transcendentals=n_tok_p * hidden_p,            # erf
        bytes_accessed=(2 * _nbytes((n_tok_p, dim_p), xdt)
                        + (1 if use_resident else n_i) * weight_bytes),
    )

    if use_resident:
        grid = (n_i,)
        in_specs = [
            pl.BlockSpec((tm_eff, dim_p), lambda i: (i, 0)),       # x token tile
            pl.BlockSpec((dim_p, hidden_p), lambda i: (0, 0)),     # W1 (resident)
            pl.BlockSpec((1, hidden_p), lambda i: (0, 0)),         # b1 (resident)
            pl.BlockSpec((hidden_p, dim_p), lambda i: (0, 0)),     # W2 (resident)
            pl.BlockSpec((1, dim_p), lambda i: (0, 0)),            # b2 (resident)
        ]
        out_specs = pl.BlockSpec((tm_eff, dim_p), lambda i: (i, 0))
        scratch_shapes = []
        kernel = _ffn_kernel_resident
        dim_sem = ("parallel",)
    else:
        n_k = hidden_p // th_eff
        grid = (n_i, n_k)
        in_specs = [
            pl.BlockSpec((tm_eff, dim_p), lambda i, k: (i, 0)),    # x token tile
            pl.BlockSpec((dim_p, th_eff), lambda i, k: (0, k)),    # W1 column slab
            pl.BlockSpec((1, th_eff), lambda i, k: (0, k)),        # b1 slab
            pl.BlockSpec((th_eff, dim_p), lambda i, k: (k, 0)),    # W2 row slab
            pl.BlockSpec((1, dim_p), lambda i, k: (0, 0)),         # b2
        ]
        out_specs = pl.BlockSpec((tm_eff, dim_p), lambda i, k: (i, 0))
        scratch_shapes = [pltpu.VMEM((tm_eff, dim_p), jnp.float32)]
        kernel = _ffn_kernel_tiled
        dim_sem = ("parallel", "arbitrary")

    out2d_p = pl.pallas_call(
        kernel,
        out_shape=jax.ShapeDtypeStruct((n_tok_p, dim_p), x.dtype),
        grid_spec=pltpu.PrefetchScalarGridSpec(
            num_scalar_prefetch=0,
            grid=grid,
            in_specs=in_specs,
            out_specs=out_specs,
            scratch_shapes=scratch_shapes,
        ),
        compiler_params=pltpu.CompilerParams(
            dimension_semantics=dim_sem,
            vmem_limit_bytes=vmem_limit,
        ),
        cost_estimate=cost,
    )(x2d_p, w1_p, b1_p, w2_p, b2_p)

    return out2d_p[:n_tok, :dim].reshape(batch, seq, dim)


def init_params(key, dim, hidden_dim, dtype=jnp.float32):
    """Deterministic init mimicking torch.nn.Linear (U[-1/sqrt(fan_in), 1/sqrt(fan_in)])."""
    k1, k2, k3, k4 = jax.random.split(key, 4)
    bound1 = 1.0 / (dim ** 0.5)
    bound2 = 1.0 / (hidden_dim ** 0.5)
    # Stored as (in_features, out_features) == torch weight transposed.
    w1 = jax.random.uniform(k1, (dim, hidden_dim), dtype, -bound1, bound1)
    b1 = jax.random.uniform(k2, (hidden_dim,), dtype, -bound1, bound1)
    w2 = jax.random.uniform(k3, (hidden_dim, dim), dtype, -bound2, bound2)
    b2 = jax.random.uniform(k4, (dim,), dtype, -bound2, bound2)
    return w1, b1, w2, b2


if __name__ == "__main__":
    key = jax.random.PRNGKey(0)

    # --- f32 weights, resident-weight fast path --------------------------
    batch, seq, dim, hidden_dim = 2, 8, 32, 64
    kx, kp = jax.random.split(key)
    x = jax.random.normal(kx, (batch, seq, dim), jnp.float32)
    w1, b1, w2, b2 = init_params(kp, dim, hidden_dim)

    out = jax.block_until_ready(feed_forward(x, w1, b1, w2, b2))

    ref = jax.nn.gelu(x @ w1 + b1, approximate=False) @ w2 + b2
    assert out.shape == (batch, seq, dim)
    assert jnp.allclose(out, ref, atol=1e-4, rtol=1e-4), "f32 resident mismatch"

    # --- f32 weights, hidden-tiled fallback path --------------------------
    hidden_dim2 = 256
    kx2, kp2 = jax.random.split(kp)
    x2 = jax.random.normal(kx2, (batch, seq, dim), jnp.float32)
    w1b, b1b, w2b, b2b = init_params(kp2, dim, hidden_dim2)
    out2 = jax.block_until_ready(
        feed_forward(x2, w1b, b1b, w2b, b2b, th=128, force_hidden_tiling=True))
    ref2 = jax.nn.gelu(x2 @ w1b + b1b, approximate=False) @ w2b + b2b
    assert jnp.allclose(out2, ref2, atol=1e-4, rtol=1e-4), "f32 tiled mismatch"

    # --- bf16 weights (full-rate MXU path), f32 activations ---------------
    out3 = jax.block_until_ready(
        feed_forward(x, w1.astype(jnp.bfloat16), b1.astype(jnp.bfloat16),
                     w2.astype(jnp.bfloat16), b2.astype(jnp.bfloat16)))
    assert out3.shape == (batch, seq, dim)
    assert jnp.allclose(out3, ref, atol=1e-1, rtol=1e-1), "bf16 mismatch"

    print("KERNEL_OK")
</pallas_src>

<mosaic_0001>
module attributes {stable_mosaic.version = 11 : i64} {
  func.func @_ffn_kernel_resident(%arg0: i32, %arg1: memref<16x128xf32, #tpu.memory_space<vmem>>, %arg2: memref<128x128xf32, #tpu.memory_space<vmem>>, %arg3: memref<1x128xf32, #tpu.memory_space<vmem>>, %arg4: memref<128x128xf32, #tpu.memory_space<vmem>>, %arg5: memref<1x128xf32, #tpu.memory_space<vmem>>, %arg6: memref<16x128xf32, #tpu.memory_space<vmem>>) attributes {dimension_semantics = [#tpu.dimension_semantics<parallel>], iteration_bounds = array<i64: 1>, scalar_prefetch = 0 : i64, scratch_operands = 0 : i64, tpu.core_type = #tpu.core_type<tc>, window_params = [{transform_indices = @transform_0, window_bounds = array<i64: 16, 128>}, {pipeline_mode = #tpu.pipeline_mode<synchronous>, transform_indices = @transform_1, window_bounds = array<i64: 128, 128>}, {pipeline_mode = #tpu.pipeline_mode<synchronous>, transform_indices = @transform_2, window_bounds = array<i64: 1, 128>}, {pipeline_mode = #tpu.pipeline_mode<synchronous>, transform_indices = @transform_3, window_bounds = array<i64: 128, 128>}, {pipeline_mode = #tpu.pipeline_mode<synchronous>, transform_indices = @transform_4, window_bounds = array<i64: 1, 128>}, {transform_indices = @transform_5, window_bounds = array<i64: 16, 128>}]} {
    %c0 = arith.constant 0 : index
    %c0_0 = arith.constant 0 : index
    %0 = vector.load %arg1[%c0, %c0_0] : memref<16x128xf32, #tpu.memory_space<vmem>>, vector<16x128xf32>
    %c0_1 = arith.constant 0 : index
    %c0_2 = arith.constant 0 : index
    %1 = vector.load %arg2[%c0_1, %c0_2] : memref<128x128xf32, #tpu.memory_space<vmem>>, vector<128x128xf32>
    %cst = arith.constant dense<0.000000e+00> : vector<16x128xf32>
    %2 = tpu.matmul %0, %1, %cst {dimension_numbers = #tpu.dot_dimension_numbers<[1], [0], [0], [1], [0, 0, 1, 1], [], []>} : vector<16x128xf32>, vector<128x128xf32>, vector<16x128xf32> -> vector<16x128xf32>
    %c0_3 = arith.constant 0 : index
    %c0_4 = arith.constant 0 : index
    %3 = vector.load %arg3[%c0_3, %c0_4] : memref<1x128xf32, #tpu.memory_space<vmem>>, vector<1x128xf32>
    %4 = vector.broadcast %3 : vector<1x128xf32> to vector<16x128xf32>
    %5 = arith.addf %2, %4 : vector<16x128xf32>
    %cst_5 = arith.constant 5.000000e-01 : f32
    %6 = vector.broadcast %cst_5 : f32 to vector<16x128xf32>
    %7 = arith.mulf %6, %5 : vector<16x128xf32>
    %cst_6 = arith.constant 0.707106769 : f32
    %8 = vector.broadcast %cst_6 : f32 to vector<16x128xf32>
    %9 = arith.mulf %5, %8 : vector<16x128xf32>
    %10 = math.erf %9 : vector<16x128xf32>
    %cst_7 = arith.constant 1.000000e+00 : f32
    %11 = vector.broadcast %cst_7 : f32 to vector<16x128xf32>
    %12 = arith.addf %11, %10 : vector<16x128xf32>
    %13 = arith.mulf %7, %12 : vector<16x128xf32>
    %c0_8 = arith.constant 0 : index
    %c0_9 = arith.constant 0 : index
    %14 = vector.load %arg4[%c0_8, %c0_9] : memref<128x128xf32, #tpu.memory_space<vmem>>, vector<128x128xf32>
    %cst_10 = arith.constant dense<0.000000e+00> : vector<16x128xf32>
    %15 = tpu.matmul %13, %14, %cst_10 {dimension_numbers = #tpu.dot_dimension_numbers<[1], [0], [0], [1], [0, 0, 1, 1], [], []>} : vector<16x128xf32>, vector<128x128xf32>, vector<16x128xf32> -> vector<16x128xf32>
    %c0_11 = arith.constant 0 : index
    %c0_12 = arith.constant 0 : index
    %16 = vector.load %arg5[%c0_11, %c0_12] : memref<1x128xf32, #tpu.memory_space<vmem>>, vector<1x128xf32>
    %17 = vector.broadcast %16 : vector<1x128xf32> to vector<16x128xf32>
    %18 = arith.addf %15, %17 : vector<16x128xf32>
    %c0_13 = arith.constant 0 : index
    %c0_14 = arith.constant 0 : index
    %19 = vector.load %arg6[%c0_13, %c0_14] : memref<16x128xf32, #tpu.memory_space<vmem>>, vector<16x128xf32>
    tpu.vector_store %arg6[%c0_13, %c0_14], %18 {strides = array<i32>} : memref<16x128xf32, #tpu.memory_space<vmem>>, vector<16x128xf32>,
    return
  }
  func.func @transform_0(%arg0: i32) -> (i32, i32) {
    %c0_i32 = arith.constant 0 : i32
    %c0_i32_0 = arith.constant 0 : i32
    return %arg0, %c0_i32 : i32, i32
  }
  func.func @transform_1(%arg0: i32) -> (i32, i32) {
    %c0_i32 = arith.constant 0 : i32
    %c0_i32_0 = arith.constant 0 : i32
    %c0_i32_1 = arith.constant 0 : i32
    return %c0_i32, %c0_i32_0 : i32, i32
  }
  func.func @transform_2(%arg0: i32) -> (i32, i32) {
    %c0_i32 = arith.constant 0 : i32
    %c0_i32_0 = arith.constant 0 : i32
    %c0_i32_1 = arith.constant 0 : i32
    return %c0_i32, %c0_i32_0 : i32, i32
  }
  func.func @transform_3(%arg0: i32) -> (i32, i32) {
    %c0_i32 = arith.constant 0 : i32
    %c0_i32_0 = arith.constant 0 : i32
    %c0_i32_1 = arith.constant 0 : i32
    return %c0_i32, %c0_i32_0 : i32, i32
  }
  func.func @transform_4(%arg0: i32) -> (i32, i32) {
    %c0_i32 = arith.constant 0 : i32
    %c0_i32_0 = arith.constant 0 : i32
    %c0_i32_1 = arith.constant 0 : i32
    return %c0_i32, %c0_i32_0 : i32, i32
  }
  func.func @transform_5(%arg0: i32) -> (i32, i32) {
    %c0_i32 = arith.constant 0 : i32
    %c0_i32_0 = arith.constant 0 : i32
    return %arg0, %c0_i32 : i32, i32
  }
}

</mosaic_0001>

<bundles_post_ra>
// kernel: feed_forward.1
= control target key start
LH: loop header
LB: loop body
LE: loop exit
PB: predicated region body
PF: predicated region fallthrough
CT: control target
= control target key end

     0   :  { %s554_s1 = inlined_call_operand.vmem [shape: f32[128,128], index: 1, kind: input, shape index: {}]   ;;  %s555_s0 = inlined_call_operand.vmem [shape: f32[16,128], index: 0, kind: input, shape index: {}]   ;;  %s556_s3 = inlined_call_operand.vmem [shape: f32[128,128], index: 3, kind: input, shape index: {}]   ;;  %s557_s2 = inlined_call_operand.vmem [shape: f32[1,128], index: 2, kind: input, shape index: {}]   ;;  %s558_s4 = inlined_call_operand.vmem [shape: f32[1,128], index: 4, kind: input, shape index: {}]   ;;  %s559_s5 = inlined_call_operand.vmem [shape: f32[16,128], index: 5, kind: output, shape index: {}]  }
   0x1   :  { %v22_v0 = vld [vmem:[%s554_s1] sm:$0xff]  ;;  %v23_v1 = vld [vmem:[%s554_s1 + $0x8] sm:$0xff]  ;;  %v24_v2 = vld [vmem:[%s554_s1 + $0x10] sm:$0xff] }
   0x2   :  { %v342_v3 = vpack.c.bf16 %v23_v1, %v22_v0  ;;  %v25_v4 = vld [vmem:[%s554_s1 + $0x18] sm:$0xff]  ;;  %v26_v6 = vld [vmem:[%s554_s1 + $0x20] sm:$0xff]  ;;  %v27_v7 = vld [vmem:[%s554_s1 + $0x28] sm:$0xff] }
   0x3   :  { %v346_v5 = vpack.c.bf16 %v25_v4, %v24_v2  ;;  %v350_v8 = vpack.c.bf16 %v27_v7, %v26_v6  ;;  %v28_v9 = vld [vmem:[%s554_s1 + $0x30] sm:$0xff]  ;;  %v29_v10 = vld [vmem:[%s554_s1 + $0x38] sm:$0xff]  ;;  %v20_v11 = vld [vmem:[%s555_s0] sm:$0xff] }
   0x4   :  { %343 = vmatprep.subr.bf16.mxu0 %v342_v3  ;;  %304 = vmatprep.mubr.f32.mxu0 %v20_v11  ;;  %v130_v12 = vld [vmem:[%s556_s3] sm:$0xff]  ;;  %v131_v13 = vld [vmem:[%s556_s3 + $0x8] sm:$0xff]  ;;  %v132_v14 = vld [vmem:[%s556_s3 + $0x10] sm:$0xff]  ;;  %v354_v20 = vpack.c.bf16 %v29_v10, %v28_v9 }
   0x5   :  { %345 = vmatpush3.bf16.msra.mxu0 %v342_v3  ;;  %v374_v15 = vpack.c.bf16 %v131_v13, %v130_v12  ;;  %v133_v16 = vld [vmem:[%s556_s3 + $0x18] sm:$0xff]  ;;  %v134_v18 = vld [vmem:[%s556_s3 + $0x20] sm:$0xff]  ;;  %v135_v19 = vld [vmem:[%s556_s3 + $0x28] sm:$0xff] }
   0x6   :  { %347 = vmatprep.subr.bf16.mxu0 %v346_v5  ;;  %v378_v17 = vpack.c.bf16 %v133_v16, %v132_v14  ;;  %v30_v21 = vld [vmem:[%s554_s1 + $0x40] sm:$0xff]  ;;  %v31_v22 = vld [vmem:[%s554_s1 + $0x48] sm:$0xff]  ;;  %v382_v23 = vpack.c.bf16 %v135_v19, %v134_v18  ;;  %v32_v25 = vld [vmem:[%s554_s1 + $0x50] sm:$0xff] }
   0x7   :  { %375 = vmatprep.subr.bf16.mxu1 %v374_v15  ;;  %v358_v24 = vpack.c.bf16 %v31_v22, %v30_v21  ;;  %v33_v26 = vld [vmem:[%s554_s1 + $0x58] sm:$0xff]  ;;  %v34_v28 = vld [vmem:[%s554_s1 + $0x60] sm:$0xff]  ;;  %v35_v29 = vld [vmem:[%s554_s1 + $0x68] sm:$0xff] }
   0x8   :  { %377 = vmatpush3.bf16.msra.mxu1 %v374_v15  ;;  %v362_v27 = vpack.c.bf16 %v33_v26, %v32_v25  ;;  %v366_v30 = vpack.c.bf16 %v35_v29, %v34_v28  ;;  %v36_v31 = vld [vmem:[%s554_s1 + $0x70] sm:$0xff]  ;;  %v37_v32 = vld [vmem:[%s554_s1 + $0x78] sm:$0xff]  ;;  %v21_v34 = vld [vmem:[%s555_s0 + $0x8] sm:$0xff] }
   0x9   :  { %349 = vmatpush3.bf16.msra.mxu0 %v346_v5  ;;  %379 = vmatprep.subr.bf16.mxu1 %v378_v17  ;;  %v370_v33 = vpack.c.bf16 %v37_v32, %v36_v31  ;;  %v136_v35 = vld [vmem:[%s556_s3 + $0x30] sm:$0xff]  ;;  %v137_v36 = vld [vmem:[%s556_s3 + $0x38] sm:$0xff]  ;;  %v138_v38 = vld [vmem:[%s556_s3 + $0x40] sm:$0xff] }
   0xa   :  { %351 = vmatprep.subr.bf16.mxu0 %v350_v8  ;;  %v386_v37 = vpack.c.bf16 %v137_v36, %v136_v35  ;;  %v139_v39 = vld [vmem:[%s556_s3 + $0x48] sm:$0xff]  ;;  %v140_v41 = vld [vmem:[%s556_s3 + $0x50] sm:$0xff]  ;;  %v141_v42 = vld [vmem:[%s556_s3 + $0x58] sm:$0xff] }
   0xb   :  { %v390_v40 = vpack.c.bf16 %v139_v39, %v138_v38  ;;  %v394_v43 = vpack.c.bf16 %v141_v42, %v140_v41  ;;  %v142_v44 = vld [vmem:[%s556_s3 + $0x60] sm:$0xff]  ;;  %v143_v45 = vld [vmem:[%s556_s3 + $0x68] sm:$0xff]  ;;  %v144_v47 = vld [vmem:[%s556_s3 + $0x70] sm:$0xff] }
   0xc   :  { %381 = vmatpush3.bf16.msra.mxu1 %v378_v17  ;;  %v398_v46 = vpack.c.bf16 %v143_v45, %v142_v44  ;;  %v145_v48 = vld [vmem:[%s556_s3 + $0x78] sm:$0xff]  ;;  %v234_v50 = vld [vmem:[%s557_s2] ss:$0 sm:$0xff] }
   0xd   :  { %353 = vmatpush3.bf16.msra.mxu0 %v350_v8  ;;  %383 = vmatprep.subr.bf16.mxu1 %v382_v23  ;;  %v402_v49 = vpack.c.bf16 %v145_v48, %v144_v47  ;;  %v235_v1 = vld [vmem:[%s558_s4] ss:$0 sm:$0xff] }
   0xe   :  { %355 = vmatprep.subr.bf16.mxu0 %v354_v20 }
  0x10   :  { %385 = vmatpush3.bf16.msra.mxu1 %v382_v23 }
  0x11   :  { %357 = vmatpush3.bf16.msra.mxu0 %v354_v20  ;;  %387 = vmatprep.subr.bf16.mxu1 %v386_v37 }
  0x12   :  { %359 = vmatprep.subr.bf16.mxu0 %v358_v24 }
  0x14   :  { %389 = vmatpush3.bf16.msra.mxu1 %v386_v37 }
  0x15   :  { %361 = vmatpush3.bf16.msra.mxu0 %v358_v24  ;;  %391 = vmatprep.subr.bf16.mxu1 %v390_v40 }
  0x16   :  { %363 = vmatprep.subr.bf16.mxu0 %v362_v27 }
  0x18   :  { %393 = vmatpush3.bf16.msra.mxu1 %v390_v40 }
  0x19   :  { %365 = vmatpush3.bf16.msra.mxu0 %v362_v27  ;;  %395 = vmatprep.subr.bf16.mxu1 %v394_v43 }
  0x1a   :  { %367 = vmatprep.subr.bf16.mxu0 %v366_v30 }
  0x1c   :  { %397 = vmatpush3.bf16.msra.mxu1 %v394_v43 }
  0x1d   :  { %369 = vmatpush3.bf16.msra.mxu0 %v366_v30  ;;  %399 = vmatprep.subr.bf16.mxu1 %v398_v46 }
  0x1e   :  { %371 = vmatprep.subr.bf16.mxu0 %v370_v33 }
  0x20   :  { %401 = vmatpush3.bf16.msra.mxu1 %v398_v46 }
  0x21   :  { %373 = vmatpush3.bf16.msra.mxu0 %v370_v33  ;;  %403 = vmatprep.subr.bf16.mxu1 %v402_v49 }
  0x24   :  { %305 = vmatmul.mubr.f32.vlgmr.msra.gmra.mrb[0].mxu0 %v21_v34  ;;  %405 = vmatpush3.bf16.msra.mxu1 %v402_v49 }
  0xf7   :  { %v306_v51 = vpop.f32.mrb[0].mxu0 }
  0xf8   :  { %v117_v52 = vadd.f32 %v306_v51, %v234_v50  ;;  %v111_v53 = vpop.f32.mrb[1].mxu0 }
  0xf9   :  { %v112_v54 = vadd.f32 %v234_v50, %v111_v53 }
  0xfa   :  { %v123_v55 = vmul.f32 0.70710677, %v117_v52  ;;  %v121_v62 = vmul.f32 0.5, %v117_v52 }
  0xfb   :  { %v122_v56 = vmul.f32 0.70710677, %v112_v54  ;;  %v120_v60 = vmul.f32 0.5, %v112_v54 }
  0xfc   :  { %406 = verf.f32 %v123_v55 }
  0xfd   :  { %408 = verf.f32 %v122_v56 }
 0x106   :  { %v407_v57 = vpop.eup %406 }
 0x107   :  { %v409_v58 = vpop.eup %408  ;;  %v127_v59 = vadd.f32 1.0, %v407_v57 }
 0x108   :  { %v126_v61 = vadd.f32 1.0, %v409_v58 }
 0x109   :  { %v129_v0 = vmul.f32 %v127_v59, %v121_v62 }
 0x10a   :  { %v128_v63 = vmul.f32 %v126_v61, %v120_v60 }
 0x10c   :  { %339 = vmatprep.mubr.f32.mxu1 %v128_v63 }
 0x10d   :  { %340 = vmatmul.mubr.f32.vlgmr.msra.gmra.mrb[0].mxu1 %v129_v0 }
 0x1e0   :  { %v341_v2 = vpop.f32.mrb[0].mxu1 }
 0x1e1   :  { %v225_v3 = vadd.f32 %v341_v2, %v235_v1  ;;  %v219_v4 = vpop.f32.mrb[1].mxu1 }
 0x1e2   :  { %v220_v5 = vadd.f32 %v235_v1, %v219_v4 }
 0x1e3   :  { %229 = vst [vmem:[%s559_s5 + $0x8] sm:$0xff] %v225_v3 }
 0x1e4   :  { %228 = vst [vmem:[%s559_s5] sm:$0xff] %v220_v5 }

</bundles_post_ra>
